<compile_context>
chip_gen: v6e
topology: v6e:2x2x1
jax: 0.10.0
libtpu: 0.0.40
codegen_flags: <defaults>
</compile_context>

<pallas_src>
import functools

import numpy as np
import jax
import jax.numpy as jnp
from jax.experimental import pallas as pl
from jax.experimental.pallas import tpu as pltpu

K = 4  # kernel size
S = 2  # stride
P = 1  # padding

COMPUTE_DTYPE = jnp.bfloat16  # MXU operand dtype; set to jnp.float32 for exactness


def _round_up(x, m):
    return -(-x // m) * m


def _upsample_kernel(xf_ref, w_ref, o_ref, patch_ref, *, wp, cin, lout):
    """One batch-image grid step (all 4 output phases at once).

    xf_ref   : (Cin, Lin)        zero-padded, flattened input image (row stride wp)
    w_ref    : (4*Cout, 9*Cin+2) folded weights (+ bias column, + zero column)
    o_ref    : (4*Cout, Lout)    all 4 phase outputs, lane-dense (Lout % 128 == 0)
    patch_ref: (9*Cin+2, Lout)   im2col scratch (+ two constant-one rows)
    """
    # Stage the 9 statically-shifted views once (flat offsets a*wp + b).
    idx = 0
    for a in range(3):
        for bshift in range(3):
            s = a * wp + bshift
            patch_ref[idx * cin:(idx + 1) * cin, :] = xf_ref[:, s:s + lout]
            idx += 1
    # Constant-one rows: row 9*cin carries the folded bias column of w_ref; the
    # second row (zero weight column) keeps the store an aligned packed pair and
    # keeps uninitialized scratch out of the contraction.
    patch_ref[9 * cin:9 * cin + 2, :] = jnp.ones((2, lout), patch_ref.dtype)
    # Single folded MXU matmul for all 4 phases (+ bias), f32 accumulation.
    acc = jnp.dot(w_ref[...], patch_ref[...], preferred_element_type=jnp.float32)
    o_ref[...] = acc.astype(o_ref.dtype)


def fold_upsample_params(w_t, b, dtype=COMPUTE_DTYPE):
    """Host-side (numpy) folding of ConvTranspose2d weight+bias. Call ONCE per params.

    w_t: (Cin, Cout, 4, 4)  PyTorch ConvTranspose2d weight layout
    b  : (Cout,)
    returns (4*Cout, 9*Cin+2) folded weight (row = phase*Cout + cout).
    """
    w = np.asarray(w_t, dtype=np.float32)
    bias = np.asarray(b, dtype=np.float32)
    cin, cout = w.shape[0], w.shape[1]
    wf = np.transpose(w[:, :, ::-1, ::-1], (2, 3, 0, 1))       # flipped, (KH,KW,Cin,Cout)
    wfold = np.zeros((4 * cout, 9 * cin + 2), np.float32)
    for ph_h in range(2):
        for ph_w in range(2):
            p = 2 * ph_h + ph_w
            rows = slice(p * cout, (p + 1) * cout)
            for dh in range(2):
                for dw in range(2):
                    col = ((ph_h + dh) * 3 + (ph_w + dw)) * cin
                    wfold[rows, col:col + cin] = wf[2 * dh + ph_h, 2 * dw + ph_w].T
            wfold[rows, 9 * cin] = bias        # bias column (multiplies the ones row)
            # column 9*cin+1 stays zero (pairs the second ones row)
    return jnp.asarray(wfold, dtype=dtype)


def upsample_forward(x_nchw, w_folded, t=None):
    """Forward pass of `Upsample` (t is ignored, as in the PyTorch module)."""
    del t
    N, C, H, W = x_nchw.shape
    OH, OW = S * H, S * W
    Wp = W + 2                       # flat row stride (1 zero column each side)
    L = H * Wp                       # valid output lanes per phase
    Lout = _round_up(L, 128)         # lane-aligned output / patch length
    max_shift = 2 * Wp + 2           # largest static tap offset
    Lin = _round_up(Lout + max_shift, 128)   # input slab length (all reads in-bounds)
    flat = (H + 2) * Wp

    # 1-pixel zero pad, flatten H,W into the lane axis, zero-fill to Lin so every
    # shifted slice of length Lout is in-bounds (extra lanes are zeros -> junk
    # output lanes that get cropped below).
    xp = jnp.pad(x_nchw, ((0, 0), (0, 0), (1, 1), (1, 1)))          # (N, C, H+2, Wp)
    xf = jnp.pad(xp.reshape(N, C, flat).astype(w_folded.dtype),
                 ((0, 0), (0, 0), (0, Lin - flat)))                 # (N, C, Lin)

    kern = functools.partial(_upsample_kernel, wp=Wp, cin=C, lout=Lout)
    out = pl.pallas_call(
        kern,
        out_shape=jax.ShapeDtypeStruct((N, 4 * C, Lout), x_nchw.dtype),
        grid=(N,),
        in_specs=[
            pl.BlockSpec((pl.Squeezed(), C, Lin), lambda n: (n, 0, 0)),
            pl.BlockSpec((4 * C, 9 * C + 2), lambda n: (0, 0)),
        ],
        out_specs=pl.BlockSpec((pl.Squeezed(), 4 * C, Lout), lambda n: (n, 0, 0)),
        scratch_shapes=[pltpu.VMEM((9 * C + 2, Lout), w_folded.dtype)],
        compiler_params=pltpu.CompilerParams(
            dimension_semantics=("parallel",),
            vmem_limit_bytes=32 * 1024 * 1024),
    )(xf, w_folded)

    # De-interleave phases (layout plumbing): crop junk lanes/cols, weave (2,2).
    o = out[:, :, :L].reshape(N, 2, 2, C, H, Wp)[..., :W]           # (N, phH, phW, C, H, W)
    y = jnp.transpose(o, (0, 3, 4, 1, 5, 2)).reshape(N, C, OH, OW)  # NCHW
    return y


def _reference_conv_transpose(x_nchw, w_t, b):
    """Pure-JAX reference (XLA) for a correctness cross-check."""
    w_conv = jnp.transpose(w_t, (1, 0, 2, 3))[:, :, ::-1, ::-1]     # (Cout, Cin, KH, KW)
    y = jax.lax.conv_general_dilated(
        x_nchw, w_conv,
        window_strides=(1, 1),
        padding=[(K - 1 - P, K - 1 - P)] * 2,
        lhs_dilation=(S, S),
        dimension_numbers=("NCHW", "OIHW", "NCHW"),
    )
    return y + b.reshape(1, -1, 1, 1)


if __name__ == "__main__":
    key = jax.random.PRNGKey(0)
    k_x, k_w, k_b, k_t = jax.random.split(key, 4)

    N, C, H, W = 2, 4, 16, 16
    x = jax.random.normal(k_x, (N, C, H, W), dtype=jnp.float32)
    # deterministic synthetic parameters (shapes from nn.ConvTranspose2d(C, C, (4,4)))
    w_t = jax.random.normal(k_w, (C, C, K, K), dtype=jnp.float32) * 0.1
    b = jax.random.normal(k_b, (C,), dtype=jnp.float32) * 0.1
    t = jax.random.normal(k_t, (N, 32), dtype=jnp.float32)   # unused, as in PyTorch forward

    # Weights are parameters: fold once on host, outside the per-call jit path.
    w_folded = fold_upsample_params(w_t, b)

    fwd = jax.jit(upsample_forward)
    out = jax.block_until_ready(fwd(x, w_folded, t))

    ref = jax.block_until_ready(_reference_conv_transpose(x, w_t, b))
    assert out.shape == (N, C, 2 * H, 2 * W), out.shape
    # bf16 MXU operands with f32 accumulation -> tolerance loosened vs the f32 ref.
    max_err = float(jnp.max(jnp.abs(out - ref)))
    assert jnp.allclose(out, ref, atol=3e-2, rtol=3e-2), max_err

    print("KERNEL_OK")
</pallas_src>

<mosaic_0001>
module attributes {stable_mosaic.version = 11 : i64} {
  func.func @_upsample_kernel(%arg0: i32, %arg1: memref<1x4x512xbf16, #tpu.memory_space<vmem>>, %arg2: memref<16x38xbf16, #tpu.memory_space<vmem>>, %arg3: memref<1x16x384xf32, #tpu.memory_space<vmem>>, %arg4: memref<38x384xbf16, #tpu.memory_space<vmem>>) attributes {dimension_semantics = [#tpu.dimension_semantics<parallel>], iteration_bounds = array<i64: 2>, scalar_prefetch = 0 : i64, scratch_operands = 1 : i64, tpu.core_type = #tpu.core_type<tc>, window_params = [{transform_indices = @transform_0, window_bounds = array<i64: 1, 4, 512>}, {pipeline_mode = #tpu.pipeline_mode<synchronous>, transform_indices = @transform_1, window_bounds = array<i64: 16, 38>}, {transform_indices = @transform_2, window_bounds = array<i64: 1, 16, 384>}]} {
    %c0 = arith.constant 0 : index
    %c0_0 = arith.constant 0 : index
    %c0_1 = arith.constant 0 : index
    %0 = vector.load %arg1[%c0, %c0_0, %c0_1] : memref<1x4x512xbf16, #tpu.memory_space<vmem>>, vector<1x4x384xbf16>
    %1 = vector.shape_cast %0 : vector<1x4x384xbf16> to vector<4x384xbf16>
    %c0_2 = arith.constant 0 : index
    %c0_3 = arith.constant 0 : index
    %2 = vector.load %arg4[%c0_2, %c0_3] : memref<38x384xbf16, #tpu.memory_space<vmem>>, vector<4x384xbf16>
    tpu.vector_store %arg4[%c0_2, %c0_3], %1 {strides = array<i32>} : memref<38x384xbf16, #tpu.memory_space<vmem>>, vector<4x384xbf16>,
    %c0_4 = arith.constant 0 : index
    %c0_5 = arith.constant 0 : index
    %c1 = arith.constant 1 : index
    %3 = vector.load %arg1[%c0_4, %c0_5, %c1] : memref<1x4x512xbf16, #tpu.memory_space<vmem>>, vector<1x4x384xbf16>
    %4 = vector.shape_cast %3 : vector<1x4x384xbf16> to vector<4x384xbf16>
    %c4 = arith.constant 4 : index
    %c0_6 = arith.constant 0 : index
    %5 = vector.load %arg4[%c4, %c0_6] : memref<38x384xbf16, #tpu.memory_space<vmem>>, vector<4x384xbf16>
    tpu.vector_store %arg4[%c4, %c0_6], %4 {strides = array<i32>} : memref<38x384xbf16, #tpu.memory_space<vmem>>, vector<4x384xbf16>,
    %c0_7 = arith.constant 0 : index
    %c0_8 = arith.constant 0 : index
    %c2 = arith.constant 2 : index
    %6 = vector.load %arg1[%c0_7, %c0_8, %c2] : memref<1x4x512xbf16, #tpu.memory_space<vmem>>, vector<1x4x384xbf16>
    %7 = vector.shape_cast %6 : vector<1x4x384xbf16> to vector<4x384xbf16>
    %c8 = arith.constant 8 : index
    %c0_9 = arith.constant 0 : index
    %8 = vector.load %arg4[%c8, %c0_9] : memref<38x384xbf16, #tpu.memory_space<vmem>>, vector<4x384xbf16>
    tpu.vector_store %arg4[%c8, %c0_9], %7 {strides = array<i32>} : memref<38x384xbf16, #tpu.memory_space<vmem>>, vector<4x384xbf16>,
    %c0_10 = arith.constant 0 : index
    %c0_11 = arith.constant 0 : index
    %c18 = arith.constant 18 : index
    %9 = vector.load %arg1[%c0_10, %c0_11, %c18] : memref<1x4x512xbf16, #tpu.memory_space<vmem>>, vector<1x4x384xbf16>
    %10 = vector.shape_cast %9 : vector<1x4x384xbf16> to vector<4x384xbf16>
    %c12 = arith.constant 12 : index
    %c0_12 = arith.constant 0 : index
    %11 = vector.load %arg4[%c12, %c0_12] : memref<38x384xbf16, #tpu.memory_space<vmem>>, vector<4x384xbf16>
    tpu.vector_store %arg4[%c12, %c0_12], %10 {strides = array<i32>} : memref<38x384xbf16, #tpu.memory_space<vmem>>, vector<4x384xbf16>,
    %c0_13 = arith.constant 0 : index
    %c0_14 = arith.constant 0 : index
    %c19 = arith.constant 19 : index
    %12 = vector.load %arg1[%c0_13, %c0_14, %c19] : memref<1x4x512xbf16, #tpu.memory_space<vmem>>, vector<1x4x384xbf16>
    %13 = vector.shape_cast %12 : vector<1x4x384xbf16> to vector<4x384xbf16>
    %c16 = arith.constant 16 : index
    %c0_15 = arith.constant 0 : index
    %14 = vector.load %arg4[%c16, %c0_15] : memref<38x384xbf16, #tpu.memory_space<vmem>>, vector<4x384xbf16>
    tpu.vector_store %arg4[%c16, %c0_15], %13 {strides = array<i32>} : memref<38x384xbf16, #tpu.memory_space<vmem>>, vector<4x384xbf16>,
    %c0_16 = arith.constant 0 : index
    %c0_17 = arith.constant 0 : index
    %c20 = arith.constant 20 : index
    %15 = vector.load %arg1[%c0_16, %c0_17, %c20] : memref<1x4x512xbf16, #tpu.memory_space<vmem>>, vector<1x4x384xbf16>
    %16 = vector.shape_cast %15 : vector<1x4x384xbf16> to vector<4x384xbf16>
    %c20_18 = arith.constant 20 : index
    %c0_19 = arith.constant 0 : index
    %17 = vector.load %arg4[%c20_18, %c0_19] : memref<38x384xbf16, #tpu.memory_space<vmem>>, vector<4x384xbf16>
    tpu.vector_store %arg4[%c20_18, %c0_19], %16 {strides = array<i32>} : memref<38x384xbf16, #tpu.memory_space<vmem>>, vector<4x384xbf16>,
    %c0_20 = arith.constant 0 : index
    %c0_21 = arith.constant 0 : index
    %c36 = arith.constant 36 : index
    %18 = vector.load %arg1[%c0_20, %c0_21, %c36] : memref<1x4x512xbf16, #tpu.memory_space<vmem>>, vector<1x4x384xbf16>
    %19 = vector.shape_cast %18 : vector<1x4x384xbf16> to vector<4x384xbf16>
    %c24 = arith.constant 24 : index
    %c0_22 = arith.constant 0 : index
    %20 = vector.load %arg4[%c24, %c0_22] : memref<38x384xbf16, #tpu.memory_space<vmem>>, vector<4x384xbf16>
    tpu.vector_store %arg4[%c24, %c0_22], %19 {strides = array<i32>} : memref<38x384xbf16, #tpu.memory_space<vmem>>, vector<4x384xbf16>,
    %c0_23 = arith.constant 0 : index
    %c0_24 = arith.constant 0 : index
    %c37 = arith.constant 37 : index
    %21 = vector.load %arg1[%c0_23, %c0_24, %c37] : memref<1x4x512xbf16, #tpu.memory_space<vmem>>, vector<1x4x384xbf16>
    %22 = vector.shape_cast %21 : vector<1x4x384xbf16> to vector<4x384xbf16>
    %c28 = arith.constant 28 : index
    %c0_25 = arith.constant 0 : index
    %23 = vector.load %arg4[%c28, %c0_25] : memref<38x384xbf16, #tpu.memory_space<vmem>>, vector<4x384xbf16>
    tpu.vector_store %arg4[%c28, %c0_25], %22 {strides = array<i32>} : memref<38x384xbf16, #tpu.memory_space<vmem>>, vector<4x384xbf16>,
    %c0_26 = arith.constant 0 : index
    %c0_27 = arith.constant 0 : index
    %c38 = arith.constant 38 : index
    %24 = vector.load %arg1[%c0_26, %c0_27, %c38] : memref<1x4x512xbf16, #tpu.memory_space<vmem>>, vector<1x4x384xbf16>
    %25 = vector.shape_cast %24 : vector<1x4x384xbf16> to vector<4x384xbf16>
    %c32 = arith.constant 32 : index
    %c0_28 = arith.constant 0 : index
    %26 = vector.load %arg4[%c32, %c0_28] : memref<38x384xbf16, #tpu.memory_space<vmem>>, vector<4x384xbf16>
    tpu.vector_store %arg4[%c32, %c0_28], %25 {strides = array<i32>} : memref<38x384xbf16, #tpu.memory_space<vmem>>, vector<4x384xbf16>,
    %cst = arith.constant 1.000000e+00 : bf16
    %27 = vector.broadcast %cst : bf16 to vector<2x384xbf16>
    %c36_29 = arith.constant 36 : index
    %c0_30 = arith.constant 0 : index
    %28 = vector.load %arg4[%c36_29, %c0_30] : memref<38x384xbf16, #tpu.memory_space<vmem>>, vector<2x384xbf16>
    tpu.vector_store %arg4[%c36_29, %c0_30], %27 {strides = array<i32>} : memref<38x384xbf16, #tpu.memory_space<vmem>>, vector<2x384xbf16>,
    %c0_31 = arith.constant 0 : index
    %c0_32 = arith.constant 0 : index
    %29 = vector.load %arg2[%c0_31, %c0_32] : memref<16x38xbf16, #tpu.memory_space<vmem>>, vector<16x38xbf16>
    %c0_33 = arith.constant 0 : index
    %c0_34 = arith.constant 0 : index
    %30 = vector.load %arg4[%c0_33, %c0_34] : memref<38x384xbf16, #tpu.memory_space<vmem>>, vector<38x384xbf16>
    %cst_35 = arith.constant dense<0.000000e+00> : vector<16x384xf32>
    %31 = tpu.matmul %29, %30, %cst_35 {dimension_numbers = #tpu.dot_dimension_numbers<[1], [0], [0], [1], [0, 0, 1, 1], [], []>} : vector<16x38xbf16>, vector<38x384xbf16>, vector<16x384xf32> -> vector<16x384xf32>
    %c0_36 = arith.constant 0 : index
    %c0_37 = arith.constant 0 : index
    %c0_38 = arith.constant 0 : index
    %32 = vector.load %arg3[%c0_36, %c0_37, %c0_38] : memref<1x16x384xf32, #tpu.memory_space<vmem>>, vector<1x16x384xf32>
    %33 = vector.shape_cast %32 : vector<1x16x384xf32> to vector<16x384xf32>
    %34 = vector.shape_cast %31 : vector<16x384xf32> to vector<1x16x384xf32>
    tpu.vector_store %arg3[%c0_36, %c0_37, %c0_38], %34 {strides = array<i32>} : memref<1x16x384xf32, #tpu.memory_space<vmem>>, vector<1x16x384xf32>,
    return
  }
  func.func @transform_0(%arg0: i32) -> (i32, i32, i32) {
    %c0_i32 = arith.constant 0 : i32
    %c0_i32_0 = arith.constant 0 : i32
    %c0_i32_1 = arith.constant 0 : i32
    return %arg0, %c0_i32, %c0_i32_0 : i32, i32, i32
  }
  func.func @transform_1(%arg0: i32) -> (i32, i32) {
    %c0_i32 = arith.constant 0 : i32
    %c0_i32_0 = arith.constant 0 : i32
    %c0_i32_1 = arith.constant 0 : i32
    return %c0_i32, %c0_i32_0 : i32, i32
  }
  func.func @transform_2(%arg0: i32) -> (i32, i32, i32) {
    %c0_i32 = arith.constant 0 : i32
    %c0_i32_0 = arith.constant 0 : i32
    %c0_i32_1 = arith.constant 0 : i32
    return %arg0, %c0_i32, %c0_i32_0 : i32, i32, i32
  }
}

</mosaic_0001>

<bundles_post_ra>
// kernel: upsample_forward.1
= control target key start
LH: loop header
LB: loop body
LE: loop exit
PB: predicated region body
PF: predicated region fallthrough
CT: control target
= control target key end

     0   :  { %s747_s9 = smov 0   ;;  %s788_s0 = inlined_call_operand.vmem [shape: bf16[2,4,512], index: 0, kind: input, shape index: {}]   ;;  %s789_s1 = inlined_call_operand.vmem [shape: bf16[16,38], index: 1, kind: input, shape index: {}]   ;;  %s790_s2 = inlined_call_operand.vmem [shape: f32[2,16,384], index: 2, kind: output, shape index: {}]  }
   0x1 LB: > { %s634_s10 = sadd.s32 4294967295, %s717_s9   ;;  %p638_p0 = scmp.ge.s32.totalorder %s717_s9, 1  ;;  %s717_s9 = sphi %s747_s9, %s12_s9  }
   0x2   : > { %p112_p1 = scmp.lt.s32.totalorder %s717_s9, 3 }
   0x4   : > { %p113_p2 = pnand %p638_p0, %p112_p1 }
   0x5   : > { %p134_p3 = scmp.lt.s32.totalorder (!%p113_p2), %s634_s10, 1  ;;  %s721_s15 = smov (!%p113_p2), 90  }
   0x6   : > { %116 = sbr.rel (%p113_p2) target bundleno = 379 (0x17b), region = 28  ;;  %s722_s16 = smov (!%p113_p2), 109  }
   0x7   : > { %s724_s17 = smov (!%p113_p2), 108   ;;  %s725_s18 = smov (!%p113_p2), 92  }
   0x8   : > { %s726_s19 = smov (!%p113_p2), 91   ;;  %s727_s20 = smov (!%p113_p2), 127  }
   0x9   : > { %s728_s21 = smov (!%p113_p2), 126   ;;  %s729_s22 = smov (!%p113_p2), 110  }
   0xb   : > { %v173_v0 = vlaneseq  ;;  %v719_v1 = vmov 1983009808   ;;  %s792_s10 = smov (!%p134_p3, %s634_s10), 1  ;;  %v720_v5 = vmov 1065369472   ;;  %v723_v12 = vmov 0.0  }
   0xc   : > { %v171_v2 = vunpack.c.l.s4 %v719_v1  ;;  %416 = vst [vmem:[#allocation2 + $0x30] sm:$0x44] %v720_v5  ;;  %s659_s11 = sshll.u32 %s792_s10, 3  ;;  %664 = vmatprep.subr.bf16.mxu1 %v723_v12  ;;  %vm730_vm0 = vmmov 0   ;;  %v731_v16 = vmov 0   ;;  %vm190_vm1 = vcmask 1043456  }
   0xd   : > { %v174_v3 = vshrl.u32 %v173_v0, 7  ;;  %s138_s14 = scalar_lea.vmem %s788_s0, %s659_s11  ;;  %670 = vmatprep.mubr.msk.bf16.mxu1 %vm730_vm0, %v723_v12  ;;  %521 = vmatprep.mubr.bf16.mxu0 %v731_v16  ;;  %vm409_vm2 = vcmask 736256   ;;  %vm316_vm3 = vcmask 883712   ;;  %vm285_vm4 = vcmask 891904   ;;  %s674_s25 = smul.u32 48, %s792_s10 }
   0xe   : > { %v172_v4 = vunpack.c.0.s8 %v171_v2  ;;  %v385_v7 = vld [vmem:[%s138_s14] sm:$0xff]  ;;  %vm347_vm5 = vcmask 752640   ;;  %vm479_vm6 = vcmask 1042432   ;;  %vm378_vm7 = vcmask 744448  }
   0xf   : > { %v387_v9 = vcombine.high %v385_v7, %v385_v7  ;;  %v294_v11 = vcombine.low %v385_v7, %v385_v7  ;;  %v146_v14 = vld [vmem:[%s138_s14] sm:$0x3f]  ;;  %vm192_vm8 = vcmask 1039360   ;;  %vm223_vm9 = vcmask 1031168   ;;  %s143_s28 = scalar_lea.vmem %s790_s2, %s674_s25 }
  0x10   : > { %v175_v6 = vsub.s32 %v172_v4, %v174_v3  ;;  %v148_v15 = vcombine.high %v146_v14, %v146_v14  ;;  %642 = vst.sshfl [vmem:[#allocation2] sm:$0xf pattern:$0x76325410] %v146_v14  ;;  %vm254_vm10 = vcmask 900096   ;;  %vm475_vm11 = vcmask 310272  }
  0x12   : > { %v394_v8 = vrot.slane %v385_v7, %v175_v6  ;;  %v401_v10 = vrot.slane %v387_v9, %v175_v6  ;;  %v301_v13 = vrot.slane %v294_v11, %v175_v6  ;;  %643 = vst.sshfl [vmem:[#allocation2 + $0x8] sm:$0x3 pattern:$0x76325410] %v148_v15 }
  0x14   : > { %402 = vrot.lane.b32.xlu0 %v394_v8, %s721_s15  ;;  %278 = vrot.lane.b32.xlu1 %v394_v8, %s722_s16 }
  0x18   : > { %404 = vrot.lane.b32.xlu0 %v401_v10, %s721_s15  ;;  %311 = vrot.lane.b32.xlu1 %v394_v8, %s724_s17 }
  0x1c   : > { %309 = vrot.lane.b32.xlu0 %v301_v13, %s724_s17  ;;  %280 = vrot.lane.b32.xlu1 %v401_v10, %s722_s16 }
  0x20   : > { %340 = vrot.lane.b32.xlu0 %v394_v8, %s725_s18  ;;  %342 = vrot.lane.b32.xlu1 %v401_v10, %s725_s18 }
  0x24   : > { %371 = vrot.lane.b32.xlu0 %v301_v13, %s726_s19  ;;  %373 = vrot.lane.b32.xlu1 %v394_v8, %s726_s19 }
  0x28   : > { %186 = vrot.lane.b32.xlu1 %v394_v8, %s727_s20  ;;  %184 = vrot.lane.b32.xlu0 %v301_v13, %s727_s20 }
  0x2c   : > { %218 = vrot.lane.b32.xlu1 %v401_v10, %s728_s21  ;;  %216 = vrot.lane.b32.xlu0 %v394_v8, %s728_s21 }
  0x30   : > { %249 = vrot.lane.b32.xlu1 %v394_v8, %s729_s22  ;;  %247 = vrot.lane.b32.xlu0 %v301_v13, %s729_s22 }
  0x86   : > { %v403_v17 = vpop.permute.xlu0 %402  ;;  %v279_v18 = vpop.permute.xlu1 %278 }
  0x87   : > { %v406_v21 = vrot.slane %v403_v17, 4  ;;  %v282_v30 = vrot.slane %v279_v18, 4 }
  0x8a   : > { %v405_v19 = vpop.permute.xlu0 %404  ;;  %v312_v20 = vpop.permute.xlu1 %311 }
  0x8b   : > { %v407_v22 = vrot.slane %v405_v19, 4  ;;  %v314_v23 = vrot.slane %v312_v20, 4 }
  0x8d   : > { %v408_v24 = vsel %vm190_vm1, %v406_v21, %v407_v22  ;;  %v411_v25 = vsel %vm409_vm2, %v405_v19, %v407_v22  ;;  %v318_v26 = vsel %vm316_vm3, %v312_v20, %v314_v23  ;;  %v710_v20 = vld [vmem:[%s789_s1] sm:$0xff]  }
  0x8e   : > { %v410_v27 = vsel %vm409_vm2, %v403_v17, %v408_v24  ;;  %415 = vst [vmem:[#allocation2 + $0x38] sm:$0x3] %v411_v25  ;;  %322 = vst [vmem:[#allocation2 + $0x20] sm:$0xc] %v318_v26  ;;  %v310_v28 = vpop.permute.xlu0 %309  ;;  %v281_v29 = vpop.permute.xlu1 %280 }
  0x8f   : > { %414 = vst [vmem:[#allocation2 + $0x30] sm:$0x33] %v410_v27  ;;  %v313_v31 = vrot.slane %v310_v28, 4  ;;  %v283_v32 = vrot.slane %v281_v29, 4 }
  0x91   : > { %v315_v33 = vsel %vm190_vm1, %v313_v31, %v314_v23  ;;  %v284_v34 = vsel %vm190_vm1, %v282_v30, %v283_v32  ;;  %v287_v35 = vsel %vm285_vm4, %v281_v29, %v283_v32 }
  0x92   : > { %v317_v36 = vsel %vm316_vm3, %v310_v28, %v315_v33  ;;  %v286_v37 = vsel %vm285_vm4, %v279_v18, %v284_v34  ;;  %291 = vst [vmem:[#allocation2 + $0x20] sm:$0x3] %v287_v35  ;;  %v341_v38 = vpop.permute.xlu0 %340  ;;  %v343_v39 = vpop.permute.xlu1 %342 }
  0x93   : > { %321 = vst [vmem:[#allocation2 + $0x18] sm:$0xcc] %v317_v36  ;;  %290 = vst [vmem:[#allocation2 + $0x18] sm:$0x33] %v286_v37  ;;  %v344_v40 = vrot.slane %v341_v38, 4  ;;  %v345_v41 = vrot.slane %v343_v39, 4 }
  0x95   : > { %v346_v42 = vsel %vm190_vm1, %v344_v40, %v345_v41  ;;  %v349_v43 = vsel %vm347_vm5, %v343_v39, %v345_v41  ;;  %v699_v44 = vld [vmem:[#allocation2 + $0x38] ss:$0 sps:$4 sm:$0x77]  }
  0x96   : > { %v348_v45 = vsel %vm347_vm5, %v341_v38, %v346_v42  ;;  %353 = vst [vmem:[#allocation2 + $0x2c] sm:$0x3] %v349_v43  ;;  %v372_v46 = vpop.permute.xlu0 %371  ;;  %v374_v47 = vpop.permute.xlu1 %373  ;;  %v428_v48 = vld [vmem:[#allocation2 + $0x30] sm:$0x77]  ;;  %v487_v52 = vsel %vm479_vm6, %v699_v44, 0 }
  0x97   : > { %352 = vst [vmem:[#allocation2 + $0x24] sm:$0x33] %v348_v45  ;;  %v375_v49 = vrot.slane %v372_v46, 4  ;;  %v376_v50 = vrot.slane %v374_v47, 4  ;;  %v652_v51 = vcombine.high %v428_v48, %v428_v48  ;;  %665 = vmatpush3.bf16.msra.mxu1 %v487_v52  ;;  %v651_v53 = vcombine.low %v428_v48, %v428_v48 }
  0x98   : > { %666 = vmatprep.subr.bf16.mxu1 %v723_v12 }
  0x99   : > { %v377_v54 = vsel %vm190_vm1, %v375_v49, %v376_v50  ;;  %v380_v55 = vsel %vm378_vm7, %v374_v47, %v376_v50  ;;  %654 = vmatprep.subr.msk.bf16.mxu0 %vm479_vm6, %v652_v51  ;;  %v481_v57 = vsel %vm479_vm6, %v651_v53, 0 }
  0x9a   : > { %v379_v56 = vsel %vm378_vm7, %v372_v46, %v377_v54  ;;  %384 = vst [vmem:[#allocation2 + $0x2c] sm:$0xc] %v380_v55  ;;  %v187_v58 = vpop.permute.xlu1 %186  ;;  %v185_v59 = vpop.permute.xlu0 %184  ;;  %500 = vmatpush1.bf16.msra.mxu0 %v481_v57 }
  0x9b   : > { %383 = vst [vmem:[#allocation2 + $0x24] sm:$0xcc] %v379_v56  ;;  %v189_v60 = vrot.slane %v187_v58, 4  ;;  %v188_v61 = vrot.slane %v185_v59, 4 }
  0x9d   : > { %v194_v62 = vsel %vm192_vm8, %v187_v58, %v189_v60  ;;  %v191_v63 = vsel %vm190_vm1, %v188_v61, %v189_v60 }
  0x9e   : > { %198 = vst [vmem:[#allocation2 + $0x8] sm:$0xc] %v194_v62  ;;  %v193_v0 = vsel %vm192_vm8, %v185_v59, %v191_v63  ;;  %v219_v1 = vpop.permute.xlu1 %218  ;;  %v217_v2 = vpop.permute.xlu0 %216 }
  0x9f   : > { %197 = vst [vmem:[#allocation2] sm:$0xcc] %v193_v0  ;;  %v221_v3 = vrot.slane %v219_v1, 4  ;;  %v220_v4 = vrot.slane %v217_v2, 4 }
  0xa1   : > { %v225_v5 = vsel %vm223_vm9, %v219_v1, %v221_v3  ;;  %v222_v6 = vsel %vm190_vm1, %v220_v4, %v221_v3  ;;  %v701_v7 = vld [vmem:[#allocation2 + $0x20] ss:$12 sps:$4 sm:$0xff]  }
  0xa2   : > { %229 = vst [vmem:[#allocation2 + $0x14] sm:$0x3] %v225_v5  ;;  %v224_v8 = vsel %vm223_vm9, %v217_v2, %v222_v6  ;;  %v250_v9 = vpop.permute.xlu1 %249  ;;  %v248_v10 = vpop.permute.xlu0 %247  ;;  %v702_v11 = vld [vmem:[#allocation2 + $0x1c] ss:$12 sps:$4 sm:$0xff]   ;;  %v704_v13 = vld [vmem:[#allocation2 + $0x18] ss:$12 sps:$4 sm:$0xff]   ;;  %667 = vmatpush3.bf16.msra.mxu1 %v701_v7 }
  0xa3   : > { %228 = vst [vmem:[#allocation2 + $0xc] sm:$0x33] %v224_v8  ;;  %v252_v14 = vrot.slane %v250_v9, 4  ;;  %v251_v15 = vrot.slane %v248_v10, 4  ;;  %501 = vmatprep.subr.bf16.mxu0 %v702_v11  ;;  %668 = vmatprep.subr.bf16.mxu1 %v723_v12 }
  0xa4   : > { %502 = vmatpush1.bf16.msra.mxu0 %v704_v13 }
  0xa5   : > { %v256_v16 = vsel %vm254_vm10, %v250_v9, %v252_v14  ;;  %v253_v17 = vsel %vm190_vm1, %v251_v15, %v252_v14 }
  0xa6   : > { %260 = vst [vmem:[#allocation2 + $0x14] sm:$0xc] %v256_v16  ;;  %v255_v18 = vsel %vm254_vm10, %v248_v10, %v253_v17 }
  0xa7   : > { %259 = vst [vmem:[#allocation2 + $0xc] sm:$0xcc] %v255_v18 }
  0xad   : > { %v706_v19 = vld [vmem:[#allocation2 + $0x8] ss:$12 sps:$4 sm:$0xff]  }
  0xae   : > { %v707_v21 = vld [vmem:[#allocation2 + $0x4] ss:$12 sps:$4 sm:$0xff]   ;;  %v709_v22 = vld [vmem:[#allocation2] ss:$12 sps:$4 sm:$0xff]   ;;  %669 = vmatpush3.bf16.msra.mxu1 %v706_v19 }
  0xaf   : > { %503 = vmatprep.subr.bf16.mxu0 %v707_v21 }
  0xb0   : > { %504 = vmatpush1.bf16.msra.mxu0 %v709_v22 }
  0xb1   : > { %671 = vmatmul.mubr.msk.bf16.vlgmr.msra.gmra.mxu1 %vm475_vm11, %v710_v20 }
  0xb3   : > { %655 = vmatmul.mubr.msk.bf16.vlgmr.msra.gmra.mxu0 %vm475_vm11, %v710_v20 }
 0x171   : > { %v566_v12 = vpop.f32.mrf.mxu1 }
 0x172   : > { %575 = vst [vmem:[%s143_s28 + $0x10] sm:$0xff] %v566_v12 }
 0x173   : > { %v523_v23 = vpop.f32.mrf.mxu0  ;;  %v672_v24 = vpop.f32.mrf.mxu1 }
 0x174   : > { %573 = vst [vmem:[%s143_s28] sm:$0xff] %v523_v23 }
 0x175   : > { %v525_v25 = vpop.f32.mrf.mxu0  ;;  %v569_v26 = vpop.f32.mrf.mxu1 }
 0x176   : > { %574 = vst [vmem:[%s143_s28 + $0x8] sm:$0xff] %v525_v25  ;;  %578 = vst [vmem:[%s143_s28 + $0x28] sm:$0xff] %v569_v26 }
 0x177   : > { %v527_v27 = vpop.f32.mrf.mxu0  ;;  %v673_v28 = vpop.f32.mrf.mxu1 }
 0x178   : > { %576 = vst [vmem:[%s143_s28 + $0x18] sm:$0xff] %v527_v27 }
 0x179   : > { %v529_v29 = vpop.f32.mrf.mxu0 }
 0x17a   : > { %577 = vst [vmem:[%s143_s28 + $0x20] sm:$0xff] %v529_v29 }
 0x17b PF: > { %s12_s9 = sadd.s32 1, %s717_s9  }
 0x17c   : > { %p9_p4 = scmp.ge.s32.totalorder %s12_s9, 4  }
 0x17e   :  { %11 = sbr.rel (!%p9_p4) target bundleno = 1 (0x1), region = 58 }

</bundles_post_ra>
